<compile_context>
chip_gen: v7x
topology: tpu7x:2x2x1
jax: 0.10.0
libtpu: 0.0.40
codegen_flags: <defaults>
</compile_context>

<pallas_src>
import jax
import jax.numpy as jnp
from jax.experimental import pallas as pl
from jax.experimental.pallas import tpu as pltpu


def _pa_kernel(x_ref, w1_ref, b1_ref, w2_ref, b2_ref, o_ref):
    # x_ref: (1, C, T) tile — channels on sublanes, spatial on lanes.
    x = x_ref[0]                                           # (C, T), native dtype

    # conv1x1 C -> mid (+bias), ReLU.  (mid, C) @ (C, T) on the MXU, f32 acc.
    h = jnp.dot(w1_ref[...], x, preferred_element_type=jnp.float32)
    h = jnp.maximum(h + b1_ref[...], 0.0)                  # (mid, T)

    # conv1x1 mid -> 1 (+bias), sigmoid.  mid is tiny -> VPU mul + sublane reduce.
    y = jnp.sum(h * w2_ref[...], axis=0, keepdims=True) + b2_ref[...]   # (1, T) f32
    y = jax.nn.sigmoid(y)                                  # EUP

    # Pixel attention: broadcast gate over channels (sublanes), native-dtype mul.
    o_ref[0] = (x * y.astype(x.dtype)).astype(o_ref.dtype)


def _pick_spatial_tile(hw, c, itemsize, target_bytes=2 * 1024 * 1024):
    """Spatial (lane) tile: whole H*W if small, else ~2 MiB worth, multiple of 128."""
    if c * hw * itemsize <= 2 * target_bytes:
        return hw
    t = (target_bytes // (c * itemsize)) // 128 * 128
    return int(max(128, min(t, 16384)))


def pa_layer(x_nchw, w1, b1, w2, b2):
    """PALayer forward.

    x_nchw : (N, C, H, W)
    w1     : (mid, C)   — conv1 weight with the 1x1 spatial dims squeezed
    b1     : (mid,)
    w2     : (mid,)     — conv2 weight squeezed (single output channel)
    b2     : (1,) or scalar
    """
    N, C, H, W = x_nchw.shape
    mid = w1.shape[0]
    HW = H * W
    itemsize = jnp.dtype(x_nchw.dtype).itemsize

    t_hw = _pick_spatial_tile(HW, C, itemsize)
    n_spatial = pl.cdiv(HW, t_hw)

    # NCHW kept as-is: only a free reshape to (N, C, H*W).
    x_hw = x_nchw.reshape(N, C, HW)
    b1_col = b1.reshape(mid, 1)
    w2_col = w2.reshape(mid, 1)
    b2_2d = jnp.asarray(b2, dtype=jnp.float32).reshape(1, 1)

    cost = pl.CostEstimate(
        flops=2 * N * HW * C * mid + 2 * N * HW * mid,
        transcendentals=N * HW,                              # sigmoid
        bytes_accessed=2 * N * C * HW * itemsize,            # read x + write out
    )

    out_hw = pl.pallas_call(
        _pa_kernel,
        out_shape=jax.ShapeDtypeStruct((N, C, HW), x_hw.dtype),
        grid_spec=pltpu.PrefetchScalarGridSpec(
            num_scalar_prefetch=0,
            grid=(N, n_spatial),
            in_specs=[
                pl.BlockSpec((1, C, t_hw), lambda n, s: (n, 0, s)),   # x tile
                pl.BlockSpec((mid, C), lambda n, s: (0, 0)),          # w1 (resident)
                pl.BlockSpec((mid, 1), lambda n, s: (0, 0)),          # b1
                pl.BlockSpec((mid, 1), lambda n, s: (0, 0)),          # w2
                pl.BlockSpec((1, 1), lambda n, s: (0, 0)),            # b2
            ],
            out_specs=pl.BlockSpec((1, C, t_hw), lambda n, s: (n, 0, s)),
        ),
        compiler_params=pltpu.CompilerParams(
            dimension_semantics=("parallel", "parallel"),
        ),
        cost_estimate=cost,
    )(x_hw, w1, b1_col, w2_col, b2_2d)

    return out_hw.reshape(N, C, H, W)


if __name__ == "__main__":
    # Small shapes consistent with the module (channel must be >= 8 so C // 8 >= 1).
    N, C, H, W = 2, 32, 16, 16
    mid = C // 8

    key = jax.random.PRNGKey(0)
    kx, kw1, kb1, kw2, kb2 = jax.random.split(key, 5)

    x = jax.random.normal(kx, (N, C, H, W), dtype=jnp.float32)

    # Synthetic parameters in PyTorch conv orientation (1x1 spatial dims squeezed).
    w1 = jax.random.normal(kw1, (mid, C), dtype=jnp.float32) * (1.0 / jnp.sqrt(C))
    b1 = jax.random.normal(kb1, (mid,), dtype=jnp.float32) * 0.1
    w2 = jax.random.normal(kw2, (mid,), dtype=jnp.float32) * (1.0 / jnp.sqrt(mid))
    b2 = jax.random.normal(kb2, (1,), dtype=jnp.float32) * 0.1

    out = pa_layer(x, w1, b1, w2, b2)
    jax.block_until_ready(out)

    # Plain-JAX reference in NCHW (same math as the PyTorch module).
    h_ref = jnp.maximum(
        jnp.einsum("mc,nchw->nmhw", w1, x) + b1[None, :, None, None], 0.0
    )
    y_ref = jax.nn.sigmoid(
        jnp.einsum("m,nmhw->nhw", w2, h_ref)[:, None, :, :] + b2[0]
    )
    ref = x * y_ref
    assert jnp.allclose(out, ref, atol=1e-5, rtol=1e-5)

    print("KERNEL_OK")
</pallas_src>

<mosaic_0001>
module attributes {stable_mosaic.version = 11 : i64} {
  func.func @_pa_kernel(%arg0: i32, %arg1: i32, %arg2: memref<1x32x256xf32, #tpu.memory_space<vmem>>, %arg3: memref<4x32xf32, #tpu.memory_space<vmem>>, %arg4: memref<4x1xf32, #tpu.memory_space<vmem>>, %arg5: memref<4x1xf32, #tpu.memory_space<vmem>>, %arg6: memref<1x1xf32, #tpu.memory_space<vmem>>, %arg7: memref<1x32x256xf32, #tpu.memory_space<vmem>>) attributes {dimension_semantics = [#tpu.dimension_semantics<parallel>, #tpu.dimension_semantics<parallel>], iteration_bounds = array<i64: 2, 1>, scalar_prefetch = 0 : i64, scratch_operands = 0 : i64, tpu.core_type = #tpu.core_type<tc>, window_params = [{transform_indices = @transform_0, window_bounds = array<i64: 1, 32, 256>}, {pipeline_mode = #tpu.pipeline_mode<synchronous>, transform_indices = @transform_1, window_bounds = array<i64: 4, 32>}, {pipeline_mode = #tpu.pipeline_mode<synchronous>, transform_indices = @transform_2, window_bounds = array<i64: 4, 1>}, {pipeline_mode = #tpu.pipeline_mode<synchronous>, transform_indices = @transform_3, window_bounds = array<i64: 4, 1>}, {pipeline_mode = #tpu.pipeline_mode<synchronous>, transform_indices = @transform_4, window_bounds = array<i64: 1, 1>}, {transform_indices = @transform_5, window_bounds = array<i64: 1, 32, 256>}]} {
    %c0 = arith.constant 0 : index
    %c0_0 = arith.constant 0 : index
    %c0_1 = arith.constant 0 : index
    %0 = vector.load %arg2[%c0, %c0_0, %c0_1] : memref<1x32x256xf32, #tpu.memory_space<vmem>>, vector<1x32x256xf32>
    %1 = vector.shape_cast %0 : vector<1x32x256xf32> to vector<32x256xf32>
    %c0_2 = arith.constant 0 : index
    %c0_3 = arith.constant 0 : index
    %2 = vector.load %arg3[%c0_2, %c0_3] : memref<4x32xf32, #tpu.memory_space<vmem>>, vector<4x32xf32>
    %cst = arith.constant dense<0.000000e+00> : vector<4x256xf32>
    %3 = tpu.matmul %2, %1, %cst {dimension_numbers = #tpu.dot_dimension_numbers<[1], [0], [0], [1], [0, 0, 1, 1], [], []>} : vector<4x32xf32>, vector<32x256xf32>, vector<4x256xf32> -> vector<4x256xf32>
    %c0_4 = arith.constant 0 : index
    %c0_5 = arith.constant 0 : index
    %4 = vector.load %arg4[%c0_4, %c0_5] : memref<4x1xf32, #tpu.memory_space<vmem>>, vector<4x1xf32>
    %5 = vector.broadcast %4 : vector<4x1xf32> to vector<4x256xf32>
    %6 = arith.addf %3, %5 : vector<4x256xf32>
    %cst_6 = arith.constant 0.000000e+00 : f32
    %7 = vector.broadcast %cst_6 : f32 to vector<4x256xf32>
    %8 = arith.maximumf %6, %7 : vector<4x256xf32>
    %c0_7 = arith.constant 0 : index
    %c0_8 = arith.constant 0 : index
    %9 = vector.load %arg5[%c0_7, %c0_8] : memref<4x1xf32, #tpu.memory_space<vmem>>, vector<4x1xf32>
    %10 = vector.broadcast %9 : vector<4x1xf32> to vector<4x256xf32>
    %11 = arith.mulf %8, %10 : vector<4x256xf32>
    %cst_9 = arith.constant dense<0.000000e+00> : vector<256xf32>
    %12 = vector.multi_reduction <add>, %11, %cst_9 [0] : vector<4x256xf32> to vector<256xf32>
    %13 = vector.shape_cast %12 : vector<256xf32> to vector<1x256xf32>
    %c0_10 = arith.constant 0 : index
    %c0_11 = arith.constant 0 : index
    %14 = vector.load %arg6[%c0_10, %c0_11] : memref<1x1xf32, #tpu.memory_space<vmem>>, vector<1x1xf32>
    %15 = vector.broadcast %14 : vector<1x1xf32> to vector<1x256xf32>
    %16 = arith.addf %13, %15 : vector<1x256xf32>
    %17 = arith.negf %16 : vector<1x256xf32>
    %18 = math.exp %17 : vector<1x256xf32>
    %cst_12 = arith.constant 1.000000e+00 : f32
    %19 = vector.broadcast %cst_12 : f32 to vector<1x256xf32>
    %20 = arith.addf %19, %18 : vector<1x256xf32>
    %21 = arith.divf %19, %20 : vector<1x256xf32>
    %22 = vector.broadcast %21 : vector<1x256xf32> to vector<32x256xf32>
    %23 = arith.mulf %1, %22 : vector<32x256xf32>
    %c0_13 = arith.constant 0 : index
    %c0_14 = arith.constant 0 : index
    %c0_15 = arith.constant 0 : index
    %24 = vector.load %arg7[%c0_13, %c0_14, %c0_15] : memref<1x32x256xf32, #tpu.memory_space<vmem>>, vector<1x32x256xf32>
    %25 = vector.shape_cast %24 : vector<1x32x256xf32> to vector<32x256xf32>
    %26 = vector.shape_cast %23 : vector<32x256xf32> to vector<1x32x256xf32>
    tpu.vector_store %arg7[%c0_13, %c0_14, %c0_15], %26 {strides = array<i32>} : memref<1x32x256xf32, #tpu.memory_space<vmem>>, vector<1x32x256xf32>,
    return
  }
  func.func @transform_0(%arg0: i32, %arg1: i32) -> (i32, i32, i32) {
    %c0_i32 = arith.constant 0 : i32
    %c0_i32_0 = arith.constant 0 : i32
    return %arg0, %c0_i32, %arg1 : i32, i32, i32
  }
  func.func @transform_1(%arg0: i32, %arg1: i32) -> (i32, i32) {
    %c0_i32 = arith.constant 0 : i32
    %c0_i32_0 = arith.constant 0 : i32
    %c0_i32_1 = arith.constant 0 : i32
    return %c0_i32, %c0_i32_0 : i32, i32
  }
  func.func @transform_2(%arg0: i32, %arg1: i32) -> (i32, i32) {
    %c0_i32 = arith.constant 0 : i32
    %c0_i32_0 = arith.constant 0 : i32
    %c0_i32_1 = arith.constant 0 : i32
    return %c0_i32, %c0_i32_0 : i32, i32
  }
  func.func @transform_3(%arg0: i32, %arg1: i32) -> (i32, i32) {
    %c0_i32 = arith.constant 0 : i32
    %c0_i32_0 = arith.constant 0 : i32
    %c0_i32_1 = arith.constant 0 : i32
    return %c0_i32, %c0_i32_0 : i32, i32
  }
  func.func @transform_4(%arg0: i32, %arg1: i32) -> (i32, i32) {
    %c0_i32 = arith.constant 0 : i32
    %c0_i32_0 = arith.constant 0 : i32
    %c0_i32_1 = arith.constant 0 : i32
    return %c0_i32, %c0_i32_0 : i32, i32
  }
  func.func @transform_5(%arg0: i32, %arg1: i32) -> (i32, i32, i32) {
    %c0_i32 = arith.constant 0 : i32
    %c0_i32_0 = arith.constant 0 : i32
    return %arg0, %c0_i32, %arg1 : i32, i32, i32
  }
}

</mosaic_0001>

<bundles_post_ra>
// kernel: tpu_custom_call.1
= control target key start
LH: loop header
LB: loop body
LE: loop exit
PB: predicated region body
PF: predicated region fallthrough
CT: control target
= control target key end

     0   :  { %s1004_s0 = inlined_call_operand.hbm [shape: f32[2,32,256], index: 0, kind: input, shape index: {}]   ;;  %s1005_s1 = inlined_call_operand.vmem [shape: f32[4,32], index: 1, kind: input, shape index: {}]   ;;  %s1006_s2 = inlined_call_operand.vmem [shape: f32[4,1], index: 2, kind: input, shape index: {}]   ;;  %s1007_s3 = inlined_call_operand.vmem [shape: f32[4,1], index: 3, kind: input, shape index: {}]   ;;  %s1008_s4 = inlined_call_operand.<no memory space> [shape: f32[1,1], index: 4, kind: input, shape index: {}]   ;;  %s1009_s5 = inlined_call_operand.hbm [shape: f32[2,32,256], index: 5, kind: output, shape index: {}]  }
   0x1   :  { %v10_v0 = vstv %s1008_s4 }
   0x2   :  { %11 = vst [vmem:[#allocation2] sm:$0x1] %v10_v0 }
   0x3   :  { %12 = vsyncpa [#allocation4], 0 }
   0x4   :  { %14 = vsyncpa [#allocation4 + $0x1], 0 }
   0x5   :  { %15 = vsyncpa [#allocation5], 0 }
   0x6   :  { %17 = vsyncpa [#allocation5 + $0x1], 0  ;;  %s784_s20 = smov 0   ;;  %s786_s21 = smov 0  }
   0x7   :  { %s788_s22 = smov 0   ;;  %s790_s23 = smov 0  }
   0x8   :  { %s792_s24 = smov 0   ;;  %s794_s25 = smov 0  }
   0x9 LB: > { %s523_s4 = sadd.s32 4294967295, %s741_s25   ;;  %s524_s26 = sadd.s32 4294967294, %s741_s25   ;;  %s741_s25 = sphi %s794_s25, %s23_s25   ;;  %s737_s24 = sphi %s792_s24, %s1024_s24   ;;  %s733_s23 = sphi %s790_s23, %s1023_s23   ;;  %s729_s22 = sphi %s788_s22, %s1022_s22   ;;  %s725_s21 = sphi %s786_s21, %s1021_s21   ;;  %s721_s20 = sphi %s784_s20, %s1020_s20  }
   0xa   : > { %s35_s27 = sadd.s32 1, %s737_s24  ;;  %s44_s28 = sadd.s32 1, %s729_s22 }
   0xb   : > { %p37_p0 = scmp.ge.s32.totalorder %s35_s27, 2  ;;  %p51_p1 = scmp.ne.s32.totalorder %s729_s22, %s725_s21 }
   0xc   : > { %p52_p2 = scmp.eq.s32.totalorder %s741_s25, 0  ;;  %p57_p3 = scmp.ne.s32.totalorder %s725_s21, %s721_s20 }
   0xd   : > { %s1026_s27 = smov (%p37_p0, %s35_s27), 0  ;;  %p58_p5 = scmp.eq.s32.totalorder %s523_s4, 0 }
   0xe   : > { %p825_p4 = por %p52_p2, %p51_p1  ;;  %s39_s30 = ssub.s32 %s737_s24, %s1026_s27 }
   0xf   : > { %p167_p6 = scmp.eq.s32.totalorder %s523_s4, 1  ;;  %p42_p7 = scmp.eq.s32.totalorder %s39_s30, 0 }
  0x10   : > { %p831_p8 = por %p58_p5, %p57_p3  ;;  %p173_p10 = scmp.eq.s32.totalorder %s524_s26, 1 }
  0x11   : > { %p835_p9 = por %p167_p6, %p51_p1  ;;  %p563_p13 = scmp.lt.s32.totalorder %s741_s25, 2 }
  0x12   : > { %s840_s8 = scalar_select %p42_p7, %s729_s22, %s44_s28  }
  0x13   : > { %s1013_s7 = scalar_select %p835_p9, 1, 0 }
  0x14   : > { %p842_p11 = por %p173_p10, %p57_p3  ;;  %s205_s10 = sand.u32 1, %s729_s22  }
  0x15   : > { %s527_s11 = sshll.u32 %s205_s10, 6  ;;  %s541_s12 = sshll.u32 %s737_s24, 10 }
  0x16   : > { %s1014_s9 = scalar_select %p842_p11, 1, 0 }
  0x17   : > { %s853_s15 = scalar_lea.hbm %s1004_s0, %s541_s12  ;;  %s209_s16 = scalar_lea.vmem [#allocation3], %s527_s11 }
  0x18   : > { %s218_s17 = sshll.u32 %s209_s16, 4  ;;  %p859_p0 = pnand %p563_p13, %p825_p4  ;;  %s855_s17 = int_to_ptr.vmem [resolvable:$true] %s218_s17 }
  0x19   : > { %s864_s19 = scalar_lea.sflag [#allocation4], %s205_s10  ;;  %s629_s4 = scalar_lea.hbm %s853_s15, 1024 }
  0x1a   : > { %p630_p2 = scmp.ne.s32.totalorder %s853_s15, %s629_s4  ;;  %p631_p3 = pneg %p859_p0 }
  0x1b   : > { %s634_s29 = scalar_lea.hbm %s1004_s0, 2048  ;;  %p635_p4 = scmp.lt.u32.totalorder %s853_s15, %s1004_s0 }
  0x1c   : > { %p632_p5 = pnand %p631_p3, %p630_p2  ;;  %p636_p7 = scmp.lt.u32.totalorder %s634_s29, %s629_s4 }
  0x1d   : > { %p638_p13 = scmp.lt.u32.totalorder %s629_s4, %s853_s15 }
  0x1e   : > { %p633_p6 = pneg %p632_p5  ;;  %p637_p10 = por %p636_p7, %p635_p4 }
  0x20   : > { %p639_p12 = por %p638_p13, %p637_p10 }
  0x22   : > { %p640_p1 = pnand %p639_p12, %p633_p6 }
  0x24   : > { %643 = shalt.err (!%p640_p1)
}
  0x25   : > { %s644_s10 = scalar_lea.vmem %s855_s17, 1024  ;;  %s743_s12 = smov [#allocation3]  }
  0x26   : > { %p645_p2 = scmp.ne.s32.totalorder %s855_s17, %s644_s10  ;;  %s649_s13 = sshll.u32 %s743_s12, 4  ;;  %s650_s13 = int_to_ptr.vmem [resolvable:$false] %s649_s13 }
  0x27   : > { %s651_s14 = scalar_lea.vmem %s650_s13, 2048  ;;  %p652_p9 = scmp.lt.s32.totalorder %s855_s17, %s650_s13 }
  0x28   : > { %p647_p5 = pnand %p645_p2, %p631_p3  ;;  %p653_p4 = scmp.lt.s32.totalorder %s651_s14, %s644_s10 }
  0x2a   : > { %p648_p11 = pneg %p647_p5  ;;  %p654_p7 = por %p653_p4, %p652_p9 }
  0x2c   : > { %p655_p10 = pnand %p654_p7, %p648_p11 }
  0x2e   : > { %658 = shalt.err (!%p655_p10)
}
  0x2f   : > { %s744_s16 = smov 256   ;;  %s745_s4 = smov 16  }
  0x30   : > { %558 = dma.hbm_to_vmem [thread:$0]  (!%p859_p0), %s853_s15, 1024, %s855_s17, %s864_s19, %s744_s16, %s744_s16, %s745_s4  }
  0x31   : > { %p226_p12 = scmp.lt.s32.totalorder %s741_s25, 3  ;;  %p1016_p1 = scmp.ge.s32.totalorder %s741_s25, 1 }
  0x33   : > { %p227_p3 = pnand %p1016_p1, %p226_p12 }
  0x34   : > { %s896_s26 = sand.u32 (!%p227_p3), 1, %s725_s21  }
  0x35   : > { %230 = sbr.rel (%p227_p3) target bundleno = 351 (0x15f), region = 40  ;;  %s531_s28 = sshll.u32 (!%p227_p3), %s896_s26, 6 }
  0x36   : > { %s233_s29 = scalar_lea.sflag (!%p227_p3), [#allocation4], %s896_s26  ;;  %s236_s30 = scalar_lea.vmem (!%p227_p3), [#allocation3], %s531_s28 }
  0x3c   : > { %712 = dma.done.wait (%p831_p8), %s233_s29, 1024  }
  0x3d   : > { %714 = vsyncadd (%p831_p8), %s233_s29, 4294966272  ;;  %v746_v1 = vmov 0.0   ;;  %v747_v2 = vmov 0   ;;  %v906_v3 = vld [vmem:[%s236_s30 + $0x8] sm:$0xff]  ;;  %v908_v4 = vld [vmem:[%s236_s30 + $0x18] sm:$0xff]  ;;  %vm280_vm0 = vcmask 261120   ;;  %v386_v27 = vlaneseq }
  0x3e   : > { %348 = vmatprep.mubr.f32.mxu0 %v746_v1  ;;  %619 = vset.pattern.permute.xlu0 %v747_v2  ;;  %v910_v5 = vld [vmem:[%s236_s30] sm:$0xff]  ;;  %v543_v6 = vpack.c.bf16 %v908_v4, %v906_v3  ;;  %v914_v7 = vld [vmem:[%s236_s30 + $0x10] sm:$0xff]  ;;  %v916_v8 = vld [vmem:[%s236_s30 + $0x28] sm:$0xff]  ;;  %vm365_vm1 = vcmask 1043456   ;;  %s542_s10 = sshll.u32 %s733_s23, 10  ;;  %s262_s12 = scalar_lea.vmem [#allocation6], %s531_s28 }
  0x3f   : > { %620 = vset.pattern.permute.xlu1 %v747_v2  ;;  %v918_v9 = vld [vmem:[%s236_s30 + $0x38] sm:$0xff]  ;;  %v545_v10 = vpack.c.bf16 %v914_v7, %v910_v5  ;;  %v924_v12 = vld [vmem:[%s236_s30 + $0x20] sm:$0xff]  ;;  %v926_v13 = vld [vmem:[%s236_s30 + $0x30] sm:$0xff]  ;;  %v387_v33 = vshrl.u32 %v386_v27, 7  ;;  %s436_s13 = sshll.u32 %s262_s12, 4  ;;  %s949_s4 = scalar_lea.hbm %s1009_s5, %s542_s10  ;;  %s951_s13 = int_to_ptr.vmem [resolvable:$true] %s436_s13 }
  0x40   : > { %v547_v11 = vpack.c.bf16 %v918_v9, %v916_v8  ;;  %544 = vmatprep.subr.bf16.mxu0 %v543_v6  ;;  %v274_v14 = vld [vmem:[%s1006_s2] sm:$0xf]  ;;  %v549_v16 = vpack.c.bf16 %v926_v13, %v924_v12  ;;  %s421_s23 = scalar_lea.sflag [#allocation5], %s896_s26  ;;  %s659_s28 = scalar_lea.vmem %s951_s13, 1024 }
  0x41   : > { %v380_v15 = vld [vmem:[#allocation2] sm:$0x1]  ;;  %546 = vmatpush1.bf16.msra.mxu0 %v545_v10  ;;  %277 = vperm.xlu0 %619, %v274_v14   ;;  %v388_v38 = vsub.s32 0, %v387_v33  ;;  %p660_p8 = scmp.ne.s32.totalorder %s951_s13, %s659_s28  ;;  %p1017_p9 = scmp.ne.s32.totalorder %s1013_s7, 0 }
  0x42   : > { %548 = vmatprep.subr.bf16.mxu0 %v547_v11  ;;  %v357_v17 = vld [vmem:[%s1007_s3] sm:$0xf]  ;;  %383 = vperm.xlu1 %620, %v380_v15   ;;  %s748_s29 = smov [#allocation6]  }
  0x43   : > { %v273_v18 = vld [vmem:[%s1005_s1] sm:$0xf]  ;;  %p661_p11 = pnand %p660_p8, %p1017_p9  ;;  %s663_s30 = sshll.u32 %s748_s29, 4  ;;  %s664_s30 = int_to_ptr.vmem [resolvable:$false] %s663_s30 }
  0x44   : > { %s665_s6 = scalar_lea.vmem %s664_s30, 2048  ;;  %p666_p6 = scmp.lt.s32.totalorder %s951_s13, %s664_s30 }
  0x45   : > { %550 = vmatpush1.bf16.msra.mxu0 %v549_v16  ;;  %360 = vperm.xlu0 %619, %v357_v17   ;;  %p662_p0 = pneg %p661_p11  ;;  %p667_p13 = scmp.lt.s32.totalorder %s665_s6, %s659_s28 }
  0x47   : > { %p668_p2 = por %p667_p13, %p666_p6 }
  0x48   : > { %533 = vmatmul.mubr.msk.f32.vlgmr.msra.gmra.mrb[0].mxu0 %vm280_vm0, %v273_v18 }
  0x49   : > { %p669_p5 = pnand %p668_p2, %p662_p0 }
  0xc0   : > { %v278_v19 = vpop.permute.xlu0 %277 }
  0xc1   : > { %v384_v40 = vpop.permute.xlu1 %383 }
  0xc2   : > { %v389_v44 = vrot.slane %v384_v40, %v388_v38 }
  0xc4   : > { %v361_v25 = vpop.permute.xlu0 %360 }
 0x11b   : > { %v350_v20 = vpop.f32.mrb[0].mxu0 }
 0x11c   : > { %v351_v21 = vadd.f32 %v350_v20, %v278_v19  ;;  %v352_v22 = vpop.f32.mrb[1].mxu0 }
 0x11d   : > { %v353_v23 = vadd.f32 %v352_v22, %v278_v19 }
 0x11e   : > { %v355_v24 = vmax.f32 %v351_v21, 0.0 }
 0x11f   : > { %v356_v26 = vmax.f32 %v353_v23, 0.0 }
 0x120   : > { %v363_v28 = vmul.f32 %v361_v25, %v355_v24 }
 0x121   : > { %v364_v29 = vmul.f32 %v361_v25, %v356_v26 }
 0x122   : > { %v366_v30 = vsel %vm365_vm1, %v363_v28, 0.0 }
 0x123   : > { %v367_v31 = vrot.slane %v366_v30, 4  ;;  %v373_v32 = vsel %vm365_vm1, %v364_v29, 0.0 }
 0x124   : > { %v374_v34 = vrot.slane %v373_v32, 4 }
 0x125   : > { %v368_v35 = vadd.f32 %v367_v31, %v366_v30 }
 0x126   : > { %v375_v36 = vadd.f32 %v374_v34, %v373_v32 }
 0x127   : > { %v369_v37 = vrot.slane %v368_v35, 2 }
 0x128   : > { %v376_v39 = vrot.slane %v375_v36, 2 }
 0x129   : > { %v370_v41 = vadd.f32 %v369_v37, %v368_v35 }
 0x12a   : > { %v377_v42 = vadd.f32 %v376_v39, %v375_v36 }
 0x12b   : > { %v371_v43 = vrot.slane %v370_v41, 1 }
 0x12c   : > { %v378_v45 = vrot.slane %v377_v42, 1 }
 0x12d   : > { %v372_v46 = vadd.f32 %v371_v43, %v370_v41 }
 0x12e   : > { %v379_v47 = vadd.f32 %v378_v45, %v377_v42 }
 0x12f   : > { %v390_v48 = vadd.f32 %v389_v44, %v372_v46 }
 0x130   : > { %v391_v49 = vadd.f32 %v389_v44, %v379_v47 }
 0x131   : > { %v534_v50 = vmul.f32 -1.442695, %v390_v48 }
 0x132   : > { %v535_v51 = vmul.f32 -1.442695, %v391_v49 }
 0x133   : > { %621 = vpow2.f32 %v534_v50 }
 0x134   : > { %623 = vpow2.f32 %v535_v51 }
 0x13d   : > { %v622_v52 = vpop.eup %621 }
 0x13e   : > { %v624_v53 = vpop.eup %623  ;;  %v398_v54 = vadd.f32 1.0, %v622_v52 }
 0x13f   : > { %v399_v55 = vadd.f32 1.0, %v624_v53 }
 0x140   : > { %625 = vrcp.f32 %v398_v54 }
 0x141   : > { %627 = vrcp.f32 %v399_v55 }
 0x14a   : > { %v626_v56 = vpop.eup %625 }
 0x14b   : > { %v628_v57 = vpop.eup %627  ;;  %v404_v58 = vmul.f32 %v626_v56, %v910_v5  ;;  %v406_v59 = vmul.f32 %v626_v56, %v914_v7  ;;  %v408_v60 = vmul.f32 %v626_v56, %v924_v12  ;;  %v410_v61 = vmul.f32 %v626_v56, %v926_v13 }
 0x14c   : > { %v405_v62 = vmul.f32 %v628_v57, %v906_v3  ;;  %v407_v63 = vmul.f32 %v628_v57, %v908_v4  ;;  %v409_v0 = vmul.f32 %v628_v57, %v916_v8  ;;  %v411_v1 = vmul.f32 %v628_v57, %v918_v9 }
 0x14d   : > { %412 = vst [vmem:[%s262_s12] sm:$0xff] %v404_v58  ;;  %414 = vst [vmem:[%s262_s12 + $0x10] sm:$0xff] %v406_v59 }
 0x14e   : > { %416 = vst [vmem:[%s262_s12 + $0x20] sm:$0xff] %v408_v60  ;;  %418 = vst [vmem:[%s262_s12 + $0x30] sm:$0xff] %v410_v61 }
 0x14f   : > { %413 = vst [vmem:[%s262_s12 + $0x8] sm:$0xff] %v405_v62  ;;  %415 = vst [vmem:[%s262_s12 + $0x18] sm:$0xff] %v407_v63 }
 0x150   : > { %417 = vst [vmem:[%s262_s12 + $0x28] sm:$0xff] %v409_v0  ;;  %419 = vst [vmem:[%s262_s12 + $0x38] sm:$0xff] %v411_v1 }
 0x151   : > { %672 = shalt.err (!%p669_p5)
}
 0x152   : > { %s673_s15 = scalar_lea.hbm %s949_s4, 1024  ;;  %s677_s19 = scalar_lea.hbm %s1009_s5, 2048 }
 0x153   : > { %p674_p4 = scmp.ne.s32.totalorder %s949_s4, %s673_s15  ;;  %p678_p12 = scmp.lt.u32.totalorder %s949_s4, %s1009_s5 }
 0x154   : > { %p679_p1 = scmp.lt.u32.totalorder %s677_s19, %s673_s15  ;;  %p681_p8 = scmp.lt.u32.totalorder %s673_s15, %s949_s4 }
 0x155   : > { %p675_p7 = pnand %p674_p4, %p1017_p9 }
 0x156   : > { %p680_p3 = por %p679_p1, %p678_p12 }
 0x157   : > { %p676_p10 = pneg %p675_p7 }
 0x158   : > { %p682_p11 = por %p681_p8, %p680_p3 }
 0x15a   : > { %p683_p0 = pnand %p682_p11, %p676_p10 }
 0x15c   : > { %686 = shalt.err (!%p683_p0)
}
 0x15d   : > { %s749_s12 = smov 256   ;;  %s750_s14 = smov 16  }
 0x15e   : > { %553 = dma.vmem_to_hbm [thread:$0]  (%p1017_p9), %s951_s13, 1024, %s949_s4, %s421_s23, %s749_s12, %s749_s12, %s750_s14  }
 0x15f PF: > { %s451_s16 = sand.u32 1, %s721_s20   ;;  %p1018_p6 = scmp.ne.s32.totalorder %s1014_s9, 0 }
 0x160   : > { %p1019_p13 = scmp.ge.s32.totalorder %s741_s25, 2  ;;  %s452_s28 = scalar_lea.sflag [#allocation5], %s451_s16 }
 0x162   : > { %p560_p2 = pnand %p1019_p13, %p1018_p6 }
 0x164   : > { %716 = dma.done.wait (!%p560_p2), %s452_s28, 1024  }
 0x165   : > { %718 = vsyncadd (!%p560_p2), %s452_s28, 4294966272  ;;  %s23_s25 = sadd.s32 1, %s741_s25   ;;  %s1020_s20 = smov %s725_s21 }
 0x166   : > { %p20_p5 = scmp.ge.s32.totalorder %s23_s25, 4   ;;  %s1021_s21 = smov %s729_s22 }
 0x167   : > { %s1022_s22 = smov %s840_s8  ;;  %s1023_s23 = smov %s737_s24 }
 0x168   : > { %s1024_s24 = smov %s1026_s27  ;;  %22 = sbr.rel (!%p20_p5) target bundleno = 9 (0x9), region = 85 }
 0x16f   :  { %457 = vsyncpa [#allocation4], 1 }
 0x170   :  { %459 = vsyncpa [#allocation4 + $0x1], 1 }
 0x171   :  { %460 = vsyncpa [#allocation5], 1 }
 0x172   :  { %462 = vsyncpa [#allocation5 + $0x1], 1 }

</bundles_post_ra>
